<compile_context>
chip_gen: v5e
topology: v5e:2x2
jax: 0.10.0
libtpu: 0.0.40
codegen_flags: <defaults>
</compile_context>

<pallas_src>
import functools

import jax
import jax.numpy as jnp
import numpy as np
from jax.experimental import pallas as pl
from jax.experimental.pallas import tpu as pltpu

EPS = 1e-5  # torch default eps for GroupNorm / InstanceNorm2d


# ----------------------------------------------------------------------------
# Pallas kernel: conv (f banded matmuls) + bias + ReLU + norm, Nb images/step.
# ----------------------------------------------------------------------------
def itbconv_kernel(x_ref, t_ref, c_ref, *rest, Nb, H, W, Cout, f, pd, norm, Kp):
    if norm == 'in':
        a_ref, out_ref, pad_ref = rest
    else:
        a_ref = None
        out_ref, pad_ref = rest

    Ho = H + 2 * pd - (f - 1)
    Wo = W + 2 * pd - (f - 1)

    # Zero ONLY the 2*pd H-border rows of the shared padded-input scratch
    # (the interior is fully overwritten for every image; W padding is folded
    # into the Toeplitz weights).  Done once per grid step, amortized over Nb.
    if pd > 0:
        z = jnp.zeros((pd, Kp), pad_ref.dtype)
        pad_ref[0:pd, :] = z
        pad_ref[pd + H:2 * pd + H, :] = z

    bias_row = c_ref[0:1, :]              # (1, Wo*Cout) per-channel bias, lane-tiled
    if norm == 'gn':
        gamma_row = c_ref[1:2, :]
        beta_row = c_ref[2:3, :]

    inv_sp = 1.0 / float(Ho * Wo)          # InstanceNorm: per-channel count
    inv_all = 1.0 / float(Ho * Wo * Cout)  # GroupNorm(1,C): all-element count

    for n in range(Nb):                    # unrolled: Nb images per grid step
        # Stage this image's rows into the H-padded scratch (full-lane stores).
        pad_ref[pd:pd + H, :] = x_ref[n]

        # Convolution: one MXU matmul per kernel row ky.
        #   LHS_ky = padded rows [ky, ky+Ho)       : (Ho, Kp)
        #   RHS_ky = banded weight slab for row ky : (Kp, Wo*Cout)
        acc = jnp.dot(pad_ref[0:Ho, :], t_ref[0],
                      preferred_element_type=jnp.float32)
        for ky in range(1, f):
            acc = acc + jnp.dot(pad_ref[ky:ky + Ho, :], t_ref[ky],
                                preferred_element_type=jnp.float32)

        y = jnp.maximum(acc + bias_row, 0.0)   # bias, then ReLU (ReLU BEFORE norm)

        if norm == 'gn':
            # GroupNorm(1, Cout): single-pass stats over all C*H*W elements,
            # biased variance, then per-channel affine (lane-tiled gamma/beta).
            s1 = jnp.sum(y)
            s2 = jnp.sum(y * y)
            m = s1 * inv_all
            v = jnp.maximum(s2 * inv_all - m * m, 0.0)
            y = (y - m) * jax.lax.rsqrt(v + EPS)
            y = y * gamma_row + beta_row
        else:
            # InstanceNorm2d(affine=False): per-channel stats computed entirely
            # in the lane-dense (Ho, Wo*Cout) layout.  a_ref is a 0/1 matrix
            # A[i,j] = (i % Cout == j % Cout): it sums lanes of equal channel
            # and broadcasts the per-channel sums back to every lane (MXU work).
            rs1 = jnp.sum(y, axis=0, keepdims=True)          # (1, Wo*Cout)
            rs2 = jnp.sum(y * y, axis=0, keepdims=True)      # (1, Wo*Cout)
            s1_lane = jnp.dot(rs1, a_ref[...], preferred_element_type=jnp.float32)
            s2_lane = jnp.dot(rs2, a_ref[...], preferred_element_type=jnp.float32)
            m = s1_lane * inv_sp
            v = jnp.maximum(s2_lane * inv_sp - m * m, 0.0)
            y = (y - m) * jax.lax.rsqrt(v + EPS)

        out_ref[n] = y.astype(out_ref.dtype)   # (Ho, Wo*Cout): 256-lane dense store


# ----------------------------------------------------------------------------
# Wrapper: layout plumbing + banded-weight construction + pallas_call.
# ----------------------------------------------------------------------------
def build_row_toeplitz(w_hwio, W, pd, Kp, dtype):
    """HWIO weights (f,f,Cin,Cout) -> (f, Kp, Wo*Cout) banded matrices.

    T[ky, w_in*Cin + ci, wo*Cout + co] = w[ky, kx, ci, co] with
    kx = w_in - wo + pd (0 elsewhere), so LHS rows need no W padding.
    Rows [W*Cin, Kp) are zero (K padded to a full 128-lane multiple).
    """
    f, _, Cin, Cout = w_hwio.shape
    Wo = W + 2 * pd - (f - 1)
    slabs = []
    for ky in range(f):
        t = jnp.zeros((W * Cin, Wo * Cout), jnp.float32)
        for kx in range(f):
            sel = (jnp.arange(W)[:, None] ==
                   (jnp.arange(Wo)[None, :] + kx - pd)).astype(jnp.float32)
            t = t + jnp.kron(sel, w_hwio[ky, kx])
        slabs.append(t)
    toep = jnp.stack(slabs)                                  # (f, W*Cin, Wo*Cout)
    if Kp > W * Cin:
        toep = jnp.pad(toep, ((0, 0), (0, Kp - W * Cin), (0, 0)))
    return toep.astype(dtype)


def _pick_nb(n, cap=8):
    """Largest divisor of n that is <= cap (images batched per grid step)."""
    for nb in range(min(n, cap), 0, -1):
        if n % nb == 0:
            return nb
    return 1


def itblayer1_forward(x_nchw, params, *, f_size, pd_size, norm='gn',
                      compute_dtype=jnp.float32, nb_cap=8):
    N, Cin, H, W = x_nchw.shape
    Cout = params['w'].shape[-1]
    Ho = H + 2 * pd_size - (f_size - 1)
    Wo = W + 2 * pd_size - (f_size - 1)
    K = W * Cin
    Kp = ((K + 127) // 128) * 128          # pad reduction dim to full lanes
    WoC = Wo * Cout
    Nb = _pick_nb(N, nb_cap)

    # NCHW -> NHWC -> lane-dense (N, H, W*Cin), zero-padded to Kp lanes.
    x = jnp.transpose(x_nchw, (0, 2, 3, 1)).astype(jnp.float32).reshape(N, H, K)
    if Kp > K:
        x = jnp.pad(x, ((0, 0), (0, 0), (0, Kp - K)))
    x = x.astype(compute_dtype)

    toep = build_row_toeplitz(params['w'].astype(jnp.float32), W, pd_size, Kp,
                              compute_dtype)

    # bias / gamma / beta fused into one (8, Wo*Cout) constant (rows 0..2 used).
    consts = jnp.zeros((8, WoC), jnp.float32)
    consts = consts.at[0].set(jnp.tile(params['b'].astype(jnp.float32), Wo))
    consts = consts.at[1].set(jnp.tile(params['gamma'].astype(jnp.float32), Wo))
    consts = consts.at[2].set(jnp.tile(params['beta'].astype(jnp.float32), Wo))

    inputs = [x, toep, consts]
    in_specs = [
        pl.BlockSpec((Nb, H, Kp), lambda i: (i, 0, 0)),
        pl.BlockSpec(toep.shape, lambda i: (0, 0, 0)),
        pl.BlockSpec((8, WoC), lambda i: (0, 0)),
    ]
    if norm == 'in':
        lane = jnp.arange(WoC)
        agg = (lane[:, None] % Cout == lane[None, :] % Cout).astype(jnp.float32)
        inputs.append(agg)                                   # (WoC, WoC) 0/1
        in_specs.append(pl.BlockSpec((WoC, WoC), lambda i: (0, 0)))

    kernel = functools.partial(itbconv_kernel, Nb=Nb, H=H, W=W, Cout=Cout,
                               f=f_size, pd=pd_size, norm=norm, Kp=Kp)

    out = pl.pallas_call(
        kernel,
        out_shape=jax.ShapeDtypeStruct((N, Ho, WoC), jnp.float32),
        grid_spec=pltpu.PrefetchScalarGridSpec(
            num_scalar_prefetch=0,
            grid=(N // Nb,),
            in_specs=in_specs,
            out_specs=pl.BlockSpec((Nb, Ho, WoC), lambda i: (i, 0, 0)),
            scratch_shapes=[
                pltpu.VMEM((H + 2 * pd_size, Kp), compute_dtype)]),
        compiler_params=pltpu.CompilerParams(
            dimension_semantics=("parallel",),     # independent batch blocks
            vmem_limit_bytes=32 * 1024 * 1024),    # safe on v5e/v6e/v7x
    )(*inputs)

    out = out.reshape(N, Ho, Wo, Cout)
    return jnp.transpose(out, (0, 3, 1, 2))        # back to NCHW


# ----------------------------------------------------------------------------
# Pure-JAX reference (mirrors the PyTorch forward exactly, in NHWC)
# ----------------------------------------------------------------------------
def ref_forward(x_nhwc, p, *, f_size, pd_size, norm='gn'):
    y = jax.lax.conv_general_dilated(
        x_nhwc, p['w'], window_strides=(1, 1),
        padding=[(pd_size, pd_size), (pd_size, pd_size)],
        dimension_numbers=('NHWC', 'HWIO', 'NHWC'))
    y = y + p['b'].reshape(1, 1, 1, -1)
    y = jnp.maximum(y, 0.0)
    if norm == 'gn':
        m = jnp.mean(y, axis=(1, 2, 3), keepdims=True)
        v = jnp.mean(jnp.square(y - m), axis=(1, 2, 3), keepdims=True)
        y = (y - m) * jax.lax.rsqrt(v + EPS)
        y = y * p['gamma'].reshape(1, 1, 1, -1) + p['beta'].reshape(1, 1, 1, -1)
    else:
        m = jnp.mean(y, axis=(1, 2), keepdims=True)
        v = jnp.mean(jnp.square(y - m), axis=(1, 2), keepdims=True)
        y = (y - m) * jax.lax.rsqrt(v + EPS)
    return y


def init_params(key, in_ch, out_ch, f_size):
    k = jax.random.split(key, 4)
    w = jax.random.normal(k[0], (f_size, f_size, in_ch, out_ch),
                          jnp.float32) / np.sqrt(f_size * f_size * in_ch)
    b = 0.1 * jax.random.normal(k[1], (out_ch,), jnp.float32)
    gamma = 1.0 + 0.1 * jax.random.normal(k[2], (out_ch,), jnp.float32)
    beta = 0.1 * jax.random.normal(k[3], (out_ch,), jnp.float32)
    return {'w': w, 'b': b, 'gamma': gamma, 'beta': beta}


if __name__ == "__main__":
    key = jax.random.PRNGKey(0)
    N, in_ch, out_ch, H, W = 2, 4, 16, 16, 16
    f_size, pd_size = 3, 1

    kx, kp = jax.random.split(key)
    x_nchw = jax.random.normal(kx, (N, in_ch, H, W), jnp.float32)
    params = init_params(kp, in_ch, out_ch, f_size)
    x_nhwc = jnp.transpose(x_nchw, (0, 2, 3, 1))

    # 1) GroupNorm path, f32 MXU operands (strict check).
    out_gn = jax.block_until_ready(
        itblayer1_forward(x_nchw, params, f_size=f_size, pd_size=pd_size,
                          norm='gn'))
    ref_gn = jax.block_until_ready(jnp.transpose(
        ref_forward(x_nhwc, params, f_size=f_size, pd_size=pd_size, norm='gn'),
        (0, 3, 1, 2)))
    assert out_gn.shape == ref_gn.shape and out_gn.dtype == jnp.float32
    np.testing.assert_allclose(np.asarray(out_gn), np.asarray(ref_gn),
                               atol=2e-3, rtol=2e-3)

    # 2) InstanceNorm path (lane-dense per-channel stats via aggregation matmul).
    out_in = jax.block_until_ready(
        itblayer1_forward(x_nchw, params, f_size=f_size, pd_size=pd_size,
                          norm='in'))
    ref_in = jax.block_until_ready(jnp.transpose(
        ref_forward(x_nhwc, params, f_size=f_size, pd_size=pd_size, norm='in'),
        (0, 3, 1, 2)))
    np.testing.assert_allclose(np.asarray(out_in), np.asarray(ref_in),
                               atol=2e-3, rtol=2e-3)

    # 3) bf16 MXU operands (f32 accumulation): wider tolerance for the ~2^-8
    #    bf16 operand rounding of inputs/weights vs the f32 reference.
    out_bf = jax.block_until_ready(
        itblayer1_forward(x_nchw, params, f_size=f_size, pd_size=pd_size,
                          norm='gn', compute_dtype=jnp.bfloat16))
    np.testing.assert_allclose(np.asarray(out_bf), np.asarray(ref_gn),
                               atol=4e-2, rtol=4e-2)

    print("KERNEL_OK")
</pallas_src>

<mosaic_0001>
module attributes {stable_mosaic.version = 11 : i64} {
  func.func @itbconv_kernel(%arg0: i32, %arg1: memref<2x16x128xf32, #tpu.memory_space<vmem>>, %arg2: memref<3x128x256xf32, #tpu.memory_space<vmem>>, %arg3: memref<8x256xf32, #tpu.memory_space<vmem>>, %arg4: memref<2x16x256xf32, #tpu.memory_space<vmem>>, %arg5: memref<18x128xf32, #tpu.memory_space<vmem>>) attributes {dimension_semantics = [#tpu.dimension_semantics<parallel>], iteration_bounds = array<i64: 1>, scalar_prefetch = 0 : i64, scratch_operands = 1 : i64, tpu.core_type = #tpu.core_type<tc>, window_params = [{transform_indices = @transform_0, window_bounds = array<i64: 2, 16, 128>}, {pipeline_mode = #tpu.pipeline_mode<synchronous>, transform_indices = @transform_1, window_bounds = array<i64: 3, 128, 256>}, {pipeline_mode = #tpu.pipeline_mode<synchronous>, transform_indices = @transform_2, window_bounds = array<i64: 8, 256>}, {transform_indices = @transform_3, window_bounds = array<i64: 2, 16, 256>}]} {
    %cst = arith.constant 0.000000e+00 : f32
    %0 = vector.broadcast %cst : f32 to vector<1x128xf32>
    %c0 = arith.constant 0 : index
    %c0_0 = arith.constant 0 : index
    %1 = vector.load %arg5[%c0, %c0_0] : memref<18x128xf32, #tpu.memory_space<vmem>>, vector<1x128xf32>
    tpu.vector_store %arg5[%c0, %c0_0], %0 {strides = array<i32>} : memref<18x128xf32, #tpu.memory_space<vmem>>, vector<1x128xf32>,
    %c17 = arith.constant 17 : index
    %c0_1 = arith.constant 0 : index
    %2 = vector.load %arg5[%c17, %c0_1] : memref<18x128xf32, #tpu.memory_space<vmem>>, vector<1x128xf32>
    tpu.vector_store %arg5[%c17, %c0_1], %0 {strides = array<i32>} : memref<18x128xf32, #tpu.memory_space<vmem>>, vector<1x128xf32>,
    %c0_2 = arith.constant 0 : index
    %c0_3 = arith.constant 0 : index
    %3 = vector.load %arg3[%c0_2, %c0_3] : memref<8x256xf32, #tpu.memory_space<vmem>>, vector<1x256xf32>
    %c1 = arith.constant 1 : index
    %c0_4 = arith.constant 0 : index
    %4 = vector.load %arg3[%c1, %c0_4] : memref<8x256xf32, #tpu.memory_space<vmem>>, vector<1x256xf32>
    %c2 = arith.constant 2 : index
    %c0_5 = arith.constant 0 : index
    %5 = vector.load %arg3[%c2, %c0_5] : memref<8x256xf32, #tpu.memory_space<vmem>>, vector<1x256xf32>
    %c0_6 = arith.constant 0 : index
    %c0_7 = arith.constant 0 : index
    %c0_8 = arith.constant 0 : index
    %6 = vector.load %arg1[%c0_6, %c0_7, %c0_8] : memref<2x16x128xf32, #tpu.memory_space<vmem>>, vector<1x16x128xf32>
    %7 = vector.shape_cast %6 : vector<1x16x128xf32> to vector<16x128xf32>
    %c1_9 = arith.constant 1 : index
    %c0_10 = arith.constant 0 : index
    %8 = vector.load %arg5[%c1_9, %c0_10] : memref<18x128xf32, #tpu.memory_space<vmem>>, vector<16x128xf32>
    tpu.vector_store %arg5[%c1_9, %c0_10], %7 {strides = array<i32>} : memref<18x128xf32, #tpu.memory_space<vmem>>, vector<16x128xf32>,
    %c0_11 = arith.constant 0 : index
    %c0_12 = arith.constant 0 : index
    %9 = vector.load %arg5[%c0_11, %c0_12] : memref<18x128xf32, #tpu.memory_space<vmem>>, vector<16x128xf32>
    %c0_13 = arith.constant 0 : index
    %c0_14 = arith.constant 0 : index
    %c0_15 = arith.constant 0 : index
    %10 = vector.load %arg2[%c0_13, %c0_14, %c0_15] : memref<3x128x256xf32, #tpu.memory_space<vmem>>, vector<1x128x256xf32>
    %11 = vector.shape_cast %10 : vector<1x128x256xf32> to vector<128x256xf32>
    %cst_16 = arith.constant dense<0.000000e+00> : vector<16x256xf32>
    %12 = tpu.matmul %9, %11, %cst_16 {dimension_numbers = #tpu.dot_dimension_numbers<[1], [0], [0], [1], [0, 0, 1, 1], [], []>} : vector<16x128xf32>, vector<128x256xf32>, vector<16x256xf32> -> vector<16x256xf32>
    %c1_17 = arith.constant 1 : index
    %c0_18 = arith.constant 0 : index
    %13 = vector.load %arg5[%c1_17, %c0_18] : memref<18x128xf32, #tpu.memory_space<vmem>>, vector<16x128xf32>
    %c1_19 = arith.constant 1 : index
    %c0_20 = arith.constant 0 : index
    %c0_21 = arith.constant 0 : index
    %14 = vector.load %arg2[%c1_19, %c0_20, %c0_21] : memref<3x128x256xf32, #tpu.memory_space<vmem>>, vector<1x128x256xf32>
    %15 = vector.shape_cast %14 : vector<1x128x256xf32> to vector<128x256xf32>
    %cst_22 = arith.constant dense<0.000000e+00> : vector<16x256xf32>
    %16 = tpu.matmul %13, %15, %cst_22 {dimension_numbers = #tpu.dot_dimension_numbers<[1], [0], [0], [1], [0, 0, 1, 1], [], []>} : vector<16x128xf32>, vector<128x256xf32>, vector<16x256xf32> -> vector<16x256xf32>
    %17 = arith.addf %12, %16 : vector<16x256xf32>
    %c2_23 = arith.constant 2 : index
    %c0_24 = arith.constant 0 : index
    %18 = vector.load %arg5[%c2_23, %c0_24] : memref<18x128xf32, #tpu.memory_space<vmem>>, vector<16x128xf32>
    %c2_25 = arith.constant 2 : index
    %c0_26 = arith.constant 0 : index
    %c0_27 = arith.constant 0 : index
    %19 = vector.load %arg2[%c2_25, %c0_26, %c0_27] : memref<3x128x256xf32, #tpu.memory_space<vmem>>, vector<1x128x256xf32>
    %20 = vector.shape_cast %19 : vector<1x128x256xf32> to vector<128x256xf32>
    %cst_28 = arith.constant dense<0.000000e+00> : vector<16x256xf32>
    %21 = tpu.matmul %18, %20, %cst_28 {dimension_numbers = #tpu.dot_dimension_numbers<[1], [0], [0], [1], [0, 0, 1, 1], [], []>} : vector<16x128xf32>, vector<128x256xf32>, vector<16x256xf32> -> vector<16x256xf32>
    %22 = arith.addf %17, %21 : vector<16x256xf32>
    %23 = vector.broadcast %3 : vector<1x256xf32> to vector<16x256xf32>
    %24 = arith.addf %22, %23 : vector<16x256xf32>
    %cst_29 = arith.constant 0.000000e+00 : f32
    %25 = vector.broadcast %cst_29 : f32 to vector<16x256xf32>
    %26 = arith.maximumf %24, %25 : vector<16x256xf32>
    %27 = vector.shape_cast %26 : vector<16x256xf32> to vector<1x16x256xf32>
    %cst_30 = arith.constant dense<0.000000e+00> : vector<1xf32>
    %28 = vector.multi_reduction <add>, %27, %cst_30 [1, 2] : vector<1x16x256xf32> to vector<1xf32>
    %29 = vector.shape_cast %28 : vector<1xf32> to vector<1x1x1xf32>
    %30 = vector.extract %29[0, 0, 0] : f32 from vector<1x1x1xf32>
    %31 = arith.mulf %26, %26 : vector<16x256xf32>
    %32 = vector.shape_cast %31 : vector<16x256xf32> to vector<1x16x256xf32>
    %cst_31 = arith.constant dense<0.000000e+00> : vector<1xf32>
    %33 = vector.multi_reduction <add>, %32, %cst_31 [1, 2] : vector<1x16x256xf32> to vector<1xf32>
    %34 = vector.shape_cast %33 : vector<1xf32> to vector<1x1x1xf32>
    %35 = vector.extract %34[0, 0, 0] : f32 from vector<1x1x1xf32>
    %cst_32 = arith.constant 2.44140625E-4 : f32
    %36 = arith.mulf %30, %cst_32 : f32
    %cst_33 = arith.constant 2.44140625E-4 : f32
    %37 = arith.mulf %35, %cst_33 : f32
    %38 = arith.mulf %36, %36 : f32
    %39 = arith.subf %37, %38 : f32
    %cst_34 = arith.constant 0.000000e+00 : f32
    %40 = arith.maximumf %39, %cst_34 : f32
    %41 = vector.broadcast %36 : f32 to vector<16x256xf32>
    %42 = arith.subf %26, %41 : vector<16x256xf32>
    %cst_35 = arith.constant 9.99999974E-6 : f32
    %43 = arith.addf %40, %cst_35 : f32
    %44 = math.rsqrt %43 : f32
    %45 = vector.broadcast %44 : f32 to vector<16x256xf32>
    %46 = arith.mulf %42, %45 : vector<16x256xf32>
    %47 = vector.broadcast %4 : vector<1x256xf32> to vector<16x256xf32>
    %48 = arith.mulf %46, %47 : vector<16x256xf32>
    %49 = vector.broadcast %5 : vector<1x256xf32> to vector<16x256xf32>
    %50 = arith.addf %48, %49 : vector<16x256xf32>
    %c0_36 = arith.constant 0 : index
    %c0_37 = arith.constant 0 : index
    %c0_38 = arith.constant 0 : index
    %51 = vector.load %arg4[%c0_36, %c0_37, %c0_38] : memref<2x16x256xf32, #tpu.memory_space<vmem>>, vector<1x16x256xf32>
    %52 = vector.shape_cast %51 : vector<1x16x256xf32> to vector<16x256xf32>
    %53 = vector.shape_cast %50 : vector<16x256xf32> to vector<1x16x256xf32>
    tpu.vector_store %arg4[%c0_36, %c0_37, %c0_38], %53 {strides = array<i32>} : memref<2x16x256xf32, #tpu.memory_space<vmem>>, vector<1x16x256xf32>,
    %c1_39 = arith.constant 1 : index
    %c0_40 = arith.constant 0 : index
    %c0_41 = arith.constant 0 : index
    %54 = vector.load %arg1[%c1_39, %c0_40, %c0_41] : memref<2x16x128xf32, #tpu.memory_space<vmem>>, vector<1x16x128xf32>
    %55 = vector.shape_cast %54 : vector<1x16x128xf32> to vector<16x128xf32>
    %c1_42 = arith.constant 1 : index
    %c0_43 = arith.constant 0 : index
    %56 = vector.load %arg5[%c1_42, %c0_43] : memref<18x128xf32, #tpu.memory_space<vmem>>, vector<16x128xf32>
    tpu.vector_store %arg5[%c1_42, %c0_43], %55 {strides = array<i32>} : memref<18x128xf32, #tpu.memory_space<vmem>>, vector<16x128xf32>,
    %c0_44 = arith.constant 0 : index
    %c0_45 = arith.constant 0 : index
    %57 = vector.load %arg5[%c0_44, %c0_45] : memref<18x128xf32, #tpu.memory_space<vmem>>, vector<16x128xf32>
    %c0_46 = arith.constant 0 : index
    %c0_47 = arith.constant 0 : index
    %c0_48 = arith.constant 0 : index
    %58 = vector.load %arg2[%c0_46, %c0_47, %c0_48] : memref<3x128x256xf32, #tpu.memory_space<vmem>>, vector<1x128x256xf32>
    %59 = vector.shape_cast %58 : vector<1x128x256xf32> to vector<128x256xf32>
    %cst_49 = arith.constant dense<0.000000e+00> : vector<16x256xf32>
    %60 = tpu.matmul %57, %59, %cst_49 {dimension_numbers = #tpu.dot_dimension_numbers<[1], [0], [0], [1], [0, 0, 1, 1], [], []>} : vector<16x128xf32>, vector<128x256xf32>, vector<16x256xf32> -> vector<16x256xf32>
    %c1_50 = arith.constant 1 : index
    %c0_51 = arith.constant 0 : index
    %61 = vector.load %arg5[%c1_50, %c0_51] : memref<18x128xf32, #tpu.memory_space<vmem>>, vector<16x128xf32>
    %c1_52 = arith.constant 1 : index
    %c0_53 = arith.constant 0 : index
    %c0_54 = arith.constant 0 : index
    %62 = vector.load %arg2[%c1_52, %c0_53, %c0_54] : memref<3x128x256xf32, #tpu.memory_space<vmem>>, vector<1x128x256xf32>
    %63 = vector.shape_cast %62 : vector<1x128x256xf32> to vector<128x256xf32>
    %cst_55 = arith.constant dense<0.000000e+00> : vector<16x256xf32>
    %64 = tpu.matmul %61, %63, %cst_55 {dimension_numbers = #tpu.dot_dimension_numbers<[1], [0], [0], [1], [0, 0, 1, 1], [], []>} : vector<16x128xf32>, vector<128x256xf32>, vector<16x256xf32> -> vector<16x256xf32>
    %65 = arith.addf %60, %64 : vector<16x256xf32>
    %c2_56 = arith.constant 2 : index
    %c0_57 = arith.constant 0 : index
    %66 = vector.load %arg5[%c2_56, %c0_57] : memref<18x128xf32, #tpu.memory_space<vmem>>, vector<16x128xf32>
    %c2_58 = arith.constant 2 : index
    %c0_59 = arith.constant 0 : index
    %c0_60 = arith.constant 0 : index
    %67 = vector.load %arg2[%c2_58, %c0_59, %c0_60] : memref<3x128x256xf32, #tpu.memory_space<vmem>>, vector<1x128x256xf32>
    %68 = vector.shape_cast %67 : vector<1x128x256xf32> to vector<128x256xf32>
    %cst_61 = arith.constant dense<0.000000e+00> : vector<16x256xf32>
    %69 = tpu.matmul %66, %68, %cst_61 {dimension_numbers = #tpu.dot_dimension_numbers<[1], [0], [0], [1], [0, 0, 1, 1], [], []>} : vector<16x128xf32>, vector<128x256xf32>, vector<16x256xf32> -> vector<16x256xf32>
    %70 = arith.addf %65, %69 : vector<16x256xf32>
    %71 = vector.broadcast %3 : vector<1x256xf32> to vector<16x256xf32>
    %72 = arith.addf %70, %71 : vector<16x256xf32>
    %cst_62 = arith.constant 0.000000e+00 : f32
    %73 = vector.broadcast %cst_62 : f32 to vector<16x256xf32>
    %74 = arith.maximumf %72, %73 : vector<16x256xf32>
    %75 = vector.shape_cast %74 : vector<16x256xf32> to vector<1x16x256xf32>
    %cst_63 = arith.constant dense<0.000000e+00> : vector<1xf32>
    %76 = vector.multi_reduction <add>, %75, %cst_63 [1, 2] : vector<1x16x256xf32> to vector<1xf32>
    %77 = vector.shape_cast %76 : vector<1xf32> to vector<1x1x1xf32>
    %78 = vector.extract %77[0, 0, 0] : f32 from vector<1x1x1xf32>
    %79 = arith.mulf %74, %74 : vector<16x256xf32>
    %80 = vector.shape_cast %79 : vector<16x256xf32> to vector<1x16x256xf32>
    %cst_64 = arith.constant dense<0.000000e+00> : vector<1xf32>
    %81 = vector.multi_reduction <add>, %80, %cst_64 [1, 2] : vector<1x16x256xf32> to vector<1xf32>
    %82 = vector.shape_cast %81 : vector<1xf32> to vector<1x1x1xf32>
    %83 = vector.extract %82[0, 0, 0] : f32 from vector<1x1x1xf32>
    %cst_65 = arith.constant 2.44140625E-4 : f32
    %84 = arith.mulf %78, %cst_65 : f32
    %cst_66 = arith.constant 2.44140625E-4 : f32
    %85 = arith.mulf %83, %cst_66 : f32
    %86 = arith.mulf %84, %84 : f32
    %87 = arith.subf %85, %86 : f32
    %cst_67 = arith.constant 0.000000e+00 : f32
    %88 = arith.maximumf %87, %cst_67 : f32
    %89 = vector.broadcast %84 : f32 to vector<16x256xf32>
    %90 = arith.subf %74, %89 : vector<16x256xf32>
    %cst_68 = arith.constant 9.99999974E-6 : f32
    %91 = arith.addf %88, %cst_68 : f32
    %92 = math.rsqrt %91 : f32
    %93 = vector.broadcast %92 : f32 to vector<16x256xf32>
    %94 = arith.mulf %90, %93 : vector<16x256xf32>
    %95 = vector.broadcast %4 : vector<1x256xf32> to vector<16x256xf32>
    %96 = arith.mulf %94, %95 : vector<16x256xf32>
    %97 = vector.broadcast %5 : vector<1x256xf32> to vector<16x256xf32>
    %98 = arith.addf %96, %97 : vector<16x256xf32>
    %c1_69 = arith.constant 1 : index
    %c0_70 = arith.constant 0 : index
    %c0_71 = arith.constant 0 : index
    %99 = vector.load %arg4[%c1_69, %c0_70, %c0_71] : memref<2x16x256xf32, #tpu.memory_space<vmem>>, vector<1x16x256xf32>
    %100 = vector.shape_cast %99 : vector<1x16x256xf32> to vector<16x256xf32>
    %101 = vector.shape_cast %98 : vector<16x256xf32> to vector<1x16x256xf32>
    tpu.vector_store %arg4[%c1_69, %c0_70, %c0_71], %101 {strides = array<i32>} : memref<2x16x256xf32, #tpu.memory_space<vmem>>, vector<1x16x256xf32>,
    return
  }
  func.func @transform_0(%arg0: i32) -> (i32, i32, i32) {
    %c0_i32 = arith.constant 0 : i32
    %c0_i32_0 = arith.constant 0 : i32
    %c0_i32_1 = arith.constant 0 : i32
    return %arg0, %c0_i32, %c0_i32_0 : i32, i32, i32
  }
  func.func @transform_1(%arg0: i32) -> (i32, i32, i32) {
    %c0_i32 = arith.constant 0 : i32
    %c0_i32_0 = arith.constant 0 : i32
    %c0_i32_1 = arith.constant 0 : i32
    %c0_i32_2 = arith.constant 0 : i32
    return %c0_i32, %c0_i32_0, %c0_i32_1 : i32, i32, i32
  }
  func.func @transform_2(%arg0: i32) -> (i32, i32) {
    %c0_i32 = arith.constant 0 : i32
    %c0_i32_0 = arith.constant 0 : i32
    %c0_i32_1 = arith.constant 0 : i32
    return %c0_i32, %c0_i32_0 : i32, i32
  }
  func.func @transform_3(%arg0: i32) -> (i32, i32, i32) {
    %c0_i32 = arith.constant 0 : i32
    %c0_i32_0 = arith.constant 0 : i32
    %c0_i32_1 = arith.constant 0 : i32
    return %arg0, %c0_i32, %c0_i32_0 : i32, i32, i32
  }
}

</mosaic_0001>

<bundles_post_ra>
// kernel: tpu_custom_call.1
= control target key start
LH: loop header
LB: loop body
LE: loop exit
PB: predicated region body
PF: predicated region fallthrough
CT: control target
= control target key end

     0   :  { %8 = vsyncpa [#allocation4], 0  ;;  %s1402_s0 = inlined_call_operand.hbm [shape: f32[2,16,128], index: 0, kind: input, shape index: {}]   ;;  %s1403_s1 = inlined_call_operand.hbm [shape: f32[3,128,256], index: 1, kind: input, shape index: {}]   ;;  %s1404_s2 = inlined_call_operand.hbm [shape: f32[8,256], index: 2, kind: input, shape index: {}]   ;;  %s1405_s3 = inlined_call_operand.hbm [shape: f32[2,16,256], index: 3, kind: output, shape index: {}]  }
   0x1   :  { %9 = vsyncpa [#allocation7], 0  ;;  %s28_s14 = sshll.u32 %s1403_s1, 4  ;;  %s29_s14 = int_to_ptr.hbm [resolvable:$true] %s28_s14 }
   0x2   :  { %10 = vsyncpa [#allocation5], 0  ;;  %s882_s15 = smov [#allocation6]   ;;  %s15_s19 = sshll.u32 %s1402_s0, 4  ;;  %s16_s19 = int_to_ptr.hbm [resolvable:$true] %s15_s19 }
   0x3   :  { %s30_s16 = sshll.u32 %s882_s15, 4  ;;  %s883_s20 = smov 256   ;;  %s31_s16 = int_to_ptr.vmem [resolvable:$true] %s30_s16 }
   0x4   :  { %s884_s21 = smov 16   ;;  %s885_s22 = smov [#allocation3]  }
   0x5   :  { %36 = dma.hbm_to_vmem [thread:$0]  %s29_s14, 12288, %s31_s16, [#allocation7], %s883_s20, %s883_s20, %s884_s21  }
   0x6   :  { %s17_s23 = sshll.u32 %s885_s22, 4  ;;  %s886_s1 = smov 128   ;;  %s18_s23 = int_to_ptr.vmem [resolvable:$true] %s17_s23 }
   0x7   :  { %s887_s24 = smov 8   ;;  %s42_s27 = sshll.u32 %s1404_s2, 4  ;;  %s43_s27 = int_to_ptr.hbm [resolvable:$true] %s42_s27 }
   0x8   :  { %23 = dma.hbm_to_vmem [thread:$0]  %s16_s19, 512, %s18_s23, [#allocation4], %s886_s1, %s886_s1, %s887_s24  }
   0x9   :  { %s888_s28 = smov [#allocation8]  }
   0xa   :  { %s44_s0 = sshll.u32 %s888_s28, 4  ;;  %s45_s0 = int_to_ptr.vmem [resolvable:$true] %s44_s0 }
   0xb   :  { %47 = dma.hbm_to_vmem [thread:$0]  %s43_s27, 256, %s45_s0, [#allocation7]  }
   0xc   :  { %876 = dma.done.wait [#allocation4], 512  }
   0xd   :  { %877 = vsyncadd [#allocation4], 4294966784 }
   0xe   :  { %878 = dma.done.wait [#allocation7], 12544  }
   0xf   :  { %879 = vsyncadd [#allocation7], 4294954752  ;;  %v924_v0 = vld [vmem:[#allocation6 + $0x1f0] sm:$0xff]  ;;  %v926_v1 = vld [vmem:[#allocation6 + $0x1f8] sm:$0xff]  ;;  %v889_v4 = vmov 0.0   ;;  %s890_s7 = smov 0.0  }
  0x10   :  { %v928_v2 = vld [vmem:[#allocation6 + $0x1e0] sm:$0xff]  ;;  %140 = vmatpush.msra.mxu0 %v924_v0  ;;  %163 = vmatpush.msra.mxu1 %v926_v1  ;;  %v932_v3 = vld [vmem:[#allocation6 + $0x1e8] sm:$0xff]  ;;  %60 = vst [vmem:[#allocation2] sm:$0x1] %v889_v4  ;;  %v934_v5 = vld [vmem:[#allocation6 + $0x1d0] sm:$0xff]  ;;  %s891_s22 = smov [#allocation9]  }
  0x11   :  { %v936_v6 = vld [vmem:[#allocation6 + $0x1d8] sm:$0xff]  ;;  %61 = vst [vmem:[#allocation2 + $0x11] sm:$0x1] %v889_v4  ;;  %v940_v7 = vld [vmem:[#allocation6 + $0x1c0] sm:$0xff]  ;;  %v942_v8 = vld [vmem:[#allocation6 + $0xf0] sm:$0xff]  ;;  %s738_s23 = sshll.u32 %s891_s22, 4  ;;  %s739_s23 = int_to_ptr.vmem [resolvable:$true] %s738_s23 }
  0x12   :  { %141 = vmatpush.msra.mxu0 %v928_v2  ;;  %164 = vmatpush.msra.mxu1 %v932_v3  ;;  %v944_v9 = vld [vmem:[#allocation6 + $0x1c8] sm:$0xff]  ;;  %v947_v10 = vld [vmem:[#allocation6 + $0xe0] sm:$0xff]  ;;  %v949_v11 = vld [vmem:[#allocation6 + $0xf8] sm:$0xff]  ;;  %s740_s25 = sshll.u32 %s1405_s3, 4  ;;  %s741_s25 = int_to_ptr.hbm [resolvable:$true] %s740_s25 }
  0x13   :  { %186 = vmatpush.msra.mxu2 %v942_v8  ;;  %v953_v12 = vld [vmem:[#allocation6 + $0xd0] sm:$0xff]  ;;  %v957_v14 = vld [vmem:[#allocation6 + $0x1b8] sm:$0xff]  ;;  %209 = vmatpush.msra.mxu3 %v949_v11  ;;  %v961_v15 = vld [vmem:[#allocation6 + $0xe8] sm:$0xff] }
  0x14   :  { %142 = vmatpush.msra.mxu0 %v934_v5  ;;  %165 = vmatpush.msra.mxu1 %v936_v6  ;;  %v955_v13 = vld [vmem:[#allocation6 + $0x1b0] sm:$0xff]  ;;  %v965_v16 = vld [vmem:[#allocation6 + $0xc0] sm:$0xff]  ;;  %v967_v17 = vld [vmem:[#allocation6 + $0xd8] sm:$0xff] }
  0x15   :  { %187 = vmatpush.msra.mxu2 %v947_v10  ;;  %v969_v18 = vld [vmem:[#allocation6 + $0x1a0] sm:$0xff]  ;;  %v971_v19 = vld [vmem:[#allocation6 + $0x1a8] sm:$0xff]  ;;  %210 = vmatpush.msra.mxu3 %v961_v15  ;;  %v977_v20 = vld [vmem:[#allocation6 + $0xb0] sm:$0xff] }
  0x16   :  { %143 = vmatpush.msra.mxu0 %v940_v7  ;;  %166 = vmatpush.msra.mxu1 %v944_v9  ;;  %v979_v21 = vld [vmem:[#allocation6 + $0xc8] sm:$0xff]  ;;  %v981_v22 = vld [vmem:[#allocation6 + $0x190] sm:$0xff]  ;;  %v983_v23 = vld [vmem:[#allocation6 + $0x198] sm:$0xff] }
  0x17   :  { %188 = vmatpush.msra.mxu2 %v953_v12  ;;  %211 = vmatpush.msra.mxu3 %v967_v17  ;;  %v989_v24 = vld [vmem:[#allocation6 + $0xa0] sm:$0xff]  ;;  %v991_v25 = vld [vmem:[#allocation6 + $0xb8] sm:$0xff]  ;;  %v995_v27 = vld [vmem:[#allocation6 + $0x188] sm:$0xff] }
  0x18   :  { %144 = vmatpush.msra.mxu0 %v955_v13  ;;  %167 = vmatpush.msra.mxu1 %v957_v14  ;;  %v993_v26 = vld [vmem:[#allocation6 + $0x180] sm:$0xff]  ;;  %v1001_v28 = vld [vmem:[#allocation6 + $0x90] sm:$0xff]  ;;  %v1003_v29 = vld [vmem:[#allocation6 + $0xa8] sm:$0xff] }
  0x19   :  { %189 = vmatpush.msra.mxu2 %v965_v16  ;;  %212 = vmatpush.msra.mxu3 %v979_v21  ;;  %1429 = vst [vmem:[#allocation13_spill] sm:$0xff] %v1003_v29  ;;  %v1005_v30 = vld [vmem:[#allocation6 + $0x170] sm:$0xff]  ;;  %v1007_v31 = vld [vmem:[#allocation6 + $0x178] sm:$0xff]  ;;  %v1013_v32 = vld [vmem:[#allocation6 + $0x80] sm:$0xff] }
  0x1a   :  { %145 = vmatpush.msra.mxu0 %v969_v18  ;;  %168 = vmatpush.msra.mxu1 %v971_v19  ;;  %1430 = vst [vmem:[#allocation14_spill] sm:$0xff] %v1013_v32  ;;  %v1015_v33 = vld [vmem:[#allocation6 + $0x98] sm:$0xff]  ;;  %v1017_v34 = vld [vmem:[#allocation6 + $0x160] sm:$0xff]  ;;  %v1019_v35 = vld [vmem:[#allocation6 + $0x168] sm:$0xff] }
  0x1b   :  { %190 = vmatpush.msra.mxu2 %v977_v20  ;;  %213 = vmatpush.msra.mxu3 %v991_v25  ;;  %1431 = vst [vmem:[#allocation15_spill] sm:$0xff] %v1015_v33  ;;  %v1025_v36 = vld [vmem:[#allocation6 + $0x70] sm:$0xff]  ;;  %v1027_v37 = vld [vmem:[#allocation6 + $0x88] sm:$0xff]  ;;  %v1031_v39 = vld [vmem:[#allocation6 + $0x158] sm:$0xff] }
  0x1c   :  { %146 = vmatpush.msra.mxu0 %v981_v22  ;;  %169 = vmatpush.msra.mxu1 %v983_v23  ;;  %1432 = vst [vmem:[#allocation16_spill] sm:$0xff] %v1025_v36  ;;  %v1029_v38 = vld [vmem:[#allocation6 + $0x150] sm:$0xff]  ;;  %v1037_v40 = vld [vmem:[#allocation6 + $0x60] sm:$0xff]  ;;  %v1039_v41 = vld [vmem:[#allocation6 + $0x78] sm:$0xff] }
  0x1d   :  { %191 = vmatpush.msra.mxu2 %v989_v24  ;;  %214 = vmatpush.msra.mxu3 %v1003_v29  ;;  %1433 = vst [vmem:[#allocation17_spill] sm:$0xff] %v1027_v37  ;;  %v1041_v42 = vld [vmem:[#allocation6 + $0x140] sm:$0xff]  ;;  %v1043_v43 = vld [vmem:[#allocation6 + $0x148] sm:$0xff]  ;;  %v1049_v44 = vld [vmem:[#allocation6 + $0x50] sm:$0xff] }
  0x1e   :  { %147 = vmatpush.msra.mxu0 %v993_v26  ;;  %170 = vmatpush.msra.mxu1 %v995_v27  ;;  %1434 = vst [vmem:[#allocation18_spill] sm:$0xff] %v1037_v40  ;;  %v1051_v45 = vld [vmem:[#allocation6 + $0x68] sm:$0xff]  ;;  %v1053_v46 = vld [vmem:[#allocation6 + $0x130] sm:$0xff]  ;;  %v1055_v47 = vld [vmem:[#allocation6 + $0x138] sm:$0xff] }
  0x1f   :  { %192 = vmatpush.msra.mxu2 %v1001_v28  ;;  %215 = vmatpush.msra.mxu3 %v1015_v33  ;;  %1435 = vst [vmem:[#allocation19_spill] sm:$0xff] %v1039_v41  ;;  %v1061_v48 = vld [vmem:[#allocation6 + $0x40] sm:$0xff]  ;;  %v1063_v49 = vld [vmem:[#allocation6 + $0x58] sm:$0xff]  ;;  %v1067_v51 = vld [vmem:[#allocation6 + $0x128] sm:$0xff] }
  0x20   :  { %148 = vmatpush.msra.mxu0 %v1005_v30  ;;  %171 = vmatpush.msra.mxu1 %v1007_v31  ;;  %1436 = vst [vmem:[#allocation20_spill] sm:$0xff] %v1049_v44  ;;  %v1065_v50 = vld [vmem:[#allocation6 + $0x120] sm:$0xff]  ;;  %v1075_v53 = vld [vmem:[#allocation6 + $0x30] sm:$0xff]  ;;  %v1077_v54 = vld [vmem:[#allocation6 + $0x48] sm:$0xff] }
  0x21   :  { %193 = vmatpush.msra.mxu2 %v1013_v32  ;;  %216 = vmatpush.msra.mxu3 %v1027_v37  ;;  %1437 = vst [vmem:[#allocation21_spill] sm:$0xff] %v1051_v45  ;;  %v1071_v52 = vld [vmem:[#allocation3] sm:$0xff]  ;;  %v1080_v55 = vld [vmem:[#allocation6 + $0x110] sm:$0xff]  ;;  %v1082_v56 = vld [vmem:[#allocation6 + $0x118] sm:$0xff] }
  0x22   :  { %149 = vmatpush.msra.mxu0 %v1017_v34  ;;  %172 = vmatpush.msra.mxu1 %v1019_v35  ;;  %1438 = vst [vmem:[#allocation22_spill] sm:$0xff] %v1061_v48  ;;  %v1088_v57 = vld [vmem:[#allocation6 + $0x20] sm:$0xff]  ;;  %v1090_v58 = vld [vmem:[#allocation6 + $0x38] sm:$0xff]  ;;  %v1092_v59 = vld [vmem:[#allocation3 + $0x8] sm:$0xff] }
  0x23   :  { %194 = vmatpush.msra.mxu2 %v1025_v36  ;;  %217 = vmatpush.msra.mxu3 %v1039_v41  ;;  %1439 = vst [vmem:[#allocation23_spill] sm:$0xff] %v1063_v49  ;;  %v1094_v60 = vld [vmem:[#allocation6 + $0x100] sm:$0xff]  ;;  %v1096_v61 = vld [vmem:[#allocation6 + $0x108] sm:$0xff]  ;;  %v1103_v62 = vld [vmem:[#allocation6 + $0x2f0] sm:$0xff] }
  0x24   :  { %150 = vmatpush.msra.mxu0 %v1029_v38  ;;  %173 = vmatpush.msra.mxu1 %v1031_v39  ;;  %1440 = vst [vmem:[#allocation24_spill] sm:$0xff] %v1075_v53  ;;  %v1105_v63 = vld [vmem:[#allocation6 + $0x2f8] sm:$0xff]  ;;  %v1109_v4 = vld [vmem:[#allocation6 + $0x10] sm:$0xff]  ;;  %v1135_v41 = vld [vmem:[#allocation6 + $0x2c8] sm:$0xff] }
  0x25   :  { %195 = vmatpush.msra.mxu2 %v1037_v40  ;;  %218 = vmatpush.msra.mxu3 %v1051_v45  ;;  %1441 = vst [vmem:[#allocation25_spill] sm:$0xff] %v1077_v54  ;;  %v1127_v45 = vld [vmem:[#allocation6 + $0x2d8] sm:$0xff]  ;;  %v1137_v37 = vld [vmem:[#allocation6 + $0x8] sm:$0xff]  ;;  %v1162_v29 = vld [vmem:[#allocation6 + $0x290] sm:$0xff] }
  0x26   :  { %151 = vmatpush.msra.mxu0 %v1041_v42  ;;  %174 = vmatpush.msra.mxu1 %v1043_v43  ;;  %69 = vst [vmem:[#allocation2 + $0x1] sm:$0xff] %v1071_v52  ;;  %v1150_v32 = vld [vmem:[#allocation6 + $0x2b8] sm:$0xff] }
  0x27   :  { %196 = vmatpush.msra.mxu2 %v1049_v44  ;;  %219 = vmatpush.msra.mxu3 %v1063_v49  ;;  %1442 = vst [vmem:[#allocation26_spill] sm:$0xff] %v1088_v57  ;;  %v1111_v49 = vld [vmem:[#allocation6 + $0x28] sm:$0xff]  ;;  %v1131_v44 = vld [vmem:[#allocation6 + $0x2c0] sm:$0xff] }
  0x28   :  { %152 = vmatpush.msra.mxu0 %v1053_v46  ;;  %175 = vmatpush.msra.mxu1 %v1055_v47  ;;  %1443 = vst [vmem:[#allocation27_spill] sm:$0xff] %v1090_v58 }
  0x29   :  { %197 = vmatpush.msra.mxu2 %v1061_v48  ;;  %220 = vmatpush.msra.mxu3 %v1077_v54  ;;  %70 = vst [vmem:[#allocation2 + $0x9] sm:$0xff] %v1092_v59  ;;  %v1115_v54 = vld [vmem:[#allocation6 + $0x2e0] sm:$0xff] }
  0x2a   :  { %153 = vmatpush.msra.mxu0 %v1065_v50  ;;  %176 = vmatpush.msra.mxu1 %v1067_v51  ;;  %1444 = vst [vmem:[#allocation28_spill] sm:$0xff] %v1109_v4  ;;  %v1121_v48 = vld [vmem:[#allocation6] sm:$0xff] }
  0x2b   :  { %198 = vmatpush.msra.mxu2 %v1075_v53  ;;  %221 = vmatpush.msra.mxu3 %v1090_v58  ;;  %1445 = vst [vmem:[#allocation29_spill] sm:$0xff] %v1111_v49  ;;  %v1117_v53 = vld [vmem:[#allocation6 + $0x2e8] sm:$0xff]  ;;  %v1125_v58 = vld [vmem:[#allocation6 + $0x2d0] sm:$0xff] }
  0x2c   :  { %154 = vmatpush.msra.mxu0 %v1080_v55  ;;  %177 = vmatpush.msra.mxu1 %v1082_v56  ;;  %1446 = vst [vmem:[#allocation30_spill] sm:$0xff] %v1121_v48 }
  0x2d   :  { %199 = vmatpush.msra.mxu2 %v1088_v57  ;;  %v1123_v57 = vld [vmem:[#allocation6 + $0x18] sm:$0xff]  ;;  %222 = vmatpush.msra.mxu3 %v1111_v49  ;;  %1448 = vst [vmem:[#allocation32_spill] sm:$0xff] %v1135_v41  ;;  %v71_v40 = vld [vmem:[#allocation2] sm:$0xff]  ;;  %v1148_v49 = vld [vmem:[#allocation6 + $0x2b0] sm:$0xff] }
  0x2e   :  { %155 = vmatpush.msra.mxu0 %v1094_v60  ;;  %178 = vmatpush.msra.mxu1 %v1096_v61  ;;  %1447 = vst [vmem:[#allocation31_spill] sm:$0xff] %v1123_v57 }
  0x2f   :  { %200 = vmatpush.msra.mxu2 %v1109_v4  ;;  %1449 = vst [vmem:[#allocation33_spill] sm:$0xff] %v1137_v37  ;;  %223 = vmatpush.msra.mxu3 %v1123_v57  ;;  %v1143_v4 = vld [vmem:[#allocation3 + $0x10] sm:$0xff]  ;;  %v1156_v57 = vld [vmem:[#allocation6 + $0x2a0] sm:$0xff] }
  0x30   :  { %267 = vmatpush.msrb.mxu0 %v1103_v62  ;;  %290 = vmatpush.msrb.mxu1 %v1105_v63  ;;  %v72_v36 = vld [vmem:[#allocation2 + $0x8] sm:$0xff] }
  0x31   :  { %201 = vmatpush.msra.mxu2 %v1121_v48  ;;  %v1141_v33 = vld [vmem:[#allocation2 + $0x2] sm:$0xff]  ;;  %224 = vmatpush.msra.mxu3 %v1137_v37  ;;  %v1166_v37 = vld [vmem:[#allocation6 + $0x298] sm:$0xff] }
  0x32   :  { %268 = vmatpush.msrb.mxu0 %v1115_v54  ;;  %291 = vmatpush.msrb.mxu1 %v1117_v53  ;;  %411 = vst [vmem:[#allocation2 + $0x1] sm:$0xff] %v1143_v4  ;;  %v1158_v48 = vld [vmem:[#allocation6 + $0x2a8] sm:$0xff] }
  0x33   :  { %202 = vmatmul.f32.vlgmr.msra.gmra.mxu2 %v71_v40  ;;  %1450 = vst [vmem:[#allocation34_spill] sm:$0xff] %v1158_v48  ;;  %225 = vmatmul.f32.vlgmr.msra.gmra.mxu3 %v71_v40  ;;  %v1177_v40 = vld [vmem:[#allocation6 + $0x280] sm:$0xff] }
  0x34   :  { %269 = vmatpush.msrb.mxu0 %v1125_v58  ;;  %292 = vmatpush.msrb.mxu1 %v1127_v45 }
  0x35   :  { %481 = vmatpush.msrb.mxu2 %v924_v0  ;;  %504 = vmatpush.msrb.mxu3 %v926_v1  ;;  %v1170_v0 = vld [vmem:[#allocation3 + $0x18] sm:$0xff]  ;;  %v1185_v1 = vld [vmem:[#allocation6 + $0x270] sm:$0xff] }
  0x36   :  { %270 = vmatpush.msrb.mxu0 %v1131_v44  ;;  %293 = vmatpush.msrb.mxu1 %v1135_v41  ;;  %v1168_v41 = vld [vmem:[#allocation2 + $0xa] sm:$0xff] }
  0x37   :  { %482 = vmatpush.msrb.mxu2 %v928_v2  ;;  %412 = vst [vmem:[#allocation2 + $0x9] sm:$0xff] %v1170_v0  ;;  %505 = vmatpush.msrb.mxu3 %v932_v3  ;;  %v1179_v2 = vld [vmem:[#allocation6 + $0x288] sm:$0xff]  ;;  %v1193_v3 = vld [vmem:[#allocation6 + $0x260] sm:$0xff] }
  0x38   :  { %271 = vmatpush.msrb.mxu0 %v1148_v49  ;;  %294 = vmatpush.msrb.mxu1 %v1150_v32 }
  0x39   :  { %483 = vmatpush.msrb.mxu2 %v934_v5  ;;  %156 = vmatmul.f32.vlgmr.msra.gmra.mxu0 %v1071_v52  ;;  %v1197_v5 = vld [vmem:[#allocation6 + $0x268] sm:$0xff] }
  0x3a   :  { %272 = vmatpush.msrb.mxu0 %v1156_v57  ;;  %295 = vmatpush.msrb.mxu1 %v1158_v48  ;;  %v1187_v48 = vld [vmem:[#allocation6 + $0x278] sm:$0xff] }
  0x3b   :  { %179 = vmatmul.f32.vlgmr.msra.gmra.mxu1 %v1071_v52  ;;  %1451 = vst [vmem:[#allocation35_spill] sm:$0xff] %v1187_v48  ;;  %484 = vmatpush.msrb.mxu2 %v940_v7  ;;  %v1202_v52 = vld [vmem:[#allocation6 + $0x250] sm:$0xff]  ;;  %v1204_v7 = vld [vmem:[#allocation6 + $0x258] sm:$0xff] }
  0x3c   :  { %273 = vmatpush.msrb.mxu0 %v1162_v29  ;;  %296 = vmatpush.msrb.mxu1 %v1166_v37 }
  0x3d   :  { %506 = vmatpush.msrb.mxu3 %v936_v6  ;;  %205 = vmatmul.f32.gmra.mxu2 %v72_v36  ;;  %v1209_v6 = vld [vmem:[#allocation6 + $0x240] sm:$0xff] }
  0x3e   :  { %274 = vmatpush.msrb.mxu0 %v1177_v40  ;;  %297 = vmatpush.msrb.mxu1 %v1179_v2 }
  0x3f   :  { %507 = vmatpush.msrb.mxu3 %v944_v9  ;;  %485 = vmatpush.msrb.mxu2 %v955_v13  ;;  %v1219_v9 = vld [vmem:[#allocation6 + $0x230] sm:$0xff]  ;;  %v1221_v13 = vld [vmem:[#allocation6 + $0x238] sm:$0xff] }
  0x40   :  { %275 = vmatpush.msrb.mxu0 %v1185_v1  ;;  %298 = vmatpush.msrb.mxu1 %v1187_v48  ;;  %v1211_v48 = vld [vmem:[#allocation6 + $0x248] sm:$0xff] }
  0x41   :  { %228 = vmatmul.f32.gmra.mxu3 %v72_v36  ;;  %486 = vmatpush.msrb.mxu2 %v969_v18  ;;  %v1229_v18 = vld [vmem:[#allocation6 + $0x228] sm:$0xff]  ;;  %v1471_v36 = vld [vmem:[#allocation29_spill] sm:$0xff] }
  0x42   :  { %276 = vmatpush.msrb.mxu0 %v1193_v3  ;;  %299 = vmatpush.msrb.mxu1 %v1197_v5 }
  0x43   :  { %508 = vmatpush.msrb.mxu3 %v957_v14  ;;  %487 = vmatpush.msrb.mxu2 %v981_v22  ;;  %v1227_v14 = vld [vmem:[#allocation6 + $0x220] sm:$0xff]  ;;  %v1237_v22 = vld [vmem:[#allocation6 + $0x218] sm:$0xff] }
  0x44   :  { %277 = vmatpush.msrb.mxu0 %v1202_v52  ;;  %300 = vmatpush.msrb.mxu1 %v1204_v7 }
  0x45   :  { %509 = vmatpush.msrb.mxu3 %v971_v19  ;;  %159 = vmatmul.f32.gmra.mxu0 %v1092_v59  ;;  %v1235_v19 = vld [vmem:[#allocation6 + $0x210] sm:$0xff] }
  0x46   :  { %278 = vmatpush.msrb.mxu0 %v1209_v6  ;;  %301 = vmatpush.msrb.mxu1 %v1211_v48 }
  0x47   :  { %182 = vmatmul.f32.gmra.mxu1 %v1092_v59  ;;  %488 = vmatpush.msrb.mxu2 %v993_v26  ;;  %v1245_v26 = vld [vmem:[#allocation6 + $0x208] sm:$0xff] }
  0x48   :  { %510 = vmatpush.msrb.mxu3 %v983_v23  ;;  %279 = vmatpush.msrb.mxu0 %v1219_v9  ;;  %v1243_v23 = vld [vmem:[#allocation6 + $0x200] sm:$0xff] }
  0x49   :  { %302 = vmatpush.msrb.mxu1 %v1221_v13  ;;  %489 = vmatpush.msrb.mxu2 %v1005_v30  ;;  %v1466_v30 = vld [vmem:[#allocation24_spill] sm:$0xff] }
  0x4a   :  { %511 = vmatpush.msrb.mxu3 %v995_v27  ;;  %280 = vmatpush.msrb.mxu0 %v1227_v14  ;;  %v1463_v27 = vld [vmem:[#allocation35_spill] sm:$0xff] }
  0x4b   :  { %303 = vmatpush.msrb.mxu1 %v1229_v18  ;;  %490 = vmatpush.msrb.mxu2 %v1017_v34  ;;  %v1470_v34 = vld [vmem:[#allocation28_spill] sm:$0xff] }
  0x4c   :  { %512 = vmatpush.msrb.mxu3 %v1007_v31  ;;  %281 = vmatpush.msrb.mxu0 %v1235_v19  ;;  %v1467_v31 = vld [vmem:[#allocation25_spill] sm:$0xff] }
  0x4d   :  { %304 = vmatpush.msrb.mxu1 %v1237_v22  ;;  %491 = vmatpush.msrb.mxu2 %v1029_v38  ;;  %v573_v38 = vld [vmem:[#allocation2 + $0x2] sm:$0xff] }
  0x4e   :  { %513 = vmatpush.msrb.mxu3 %v1019_v35  ;;  %282 = vmatpush.msrb.mxu0 %v1243_v23  ;;  %v413_v35 = vld [vmem:[#allocation2] sm:$0xff] }
  0x4f   :  { %305 = vmatpush.msrb.mxu1 %v1245_v26  ;;  %283 = vmatmul.f32.vlgmr.msrb.gmra.mxu0 %v1141_v33 }
  0x50   :  { %306 = vmatmul.f32.vlgmr.msrb.gmra.mxu1 %v1141_v33  ;;  %492 = vmatpush.msrb.mxu2 %v1041_v42  ;;  %v1469_v33 = vld [vmem:[#allocation27_spill] sm:$0xff]  ;;  %v414_v42 = vld [vmem:[#allocation2 + $0x8] sm:$0xff] }
  0x51   :  { %514 = vmatpush.msrb.mxu3 %v1031_v39  ;;  %527 = vmatpush.msra.mxu0 %v942_v8  ;;  %v1452_v8 = vld [vmem:[#allocation13_spill] sm:$0xff]  ;;  %v1473_v39 = vld [vmem:[#allocation31_spill] sm:$0xff] }
  0x52   :  { %550 = vmatpush.msra.mxu1 %v949_v11  ;;  %493 = vmatpush.msrb.mxu2 %v1053_v46  ;;  %v1454_v11 = vld [vmem:[#allocation14_spill] sm:$0xff] }
  0x53   :  { %515 = vmatpush.msrb.mxu3 %v1043_v43  ;;  %528 = vmatpush.msra.mxu0 %v947_v10  ;;  %v1453_v10 = vld [vmem:[#allocation32_spill] sm:$0xff]  ;;  %v574_v43 = vld [vmem:[#allocation2 + $0xa] sm:$0xff] }
  0x54   :  { %551 = vmatpush.msra.mxu1 %v961_v15  ;;  %494 = vmatpush.msrb.mxu2 %v1065_v50  ;;  %v1456_v15 = vld [vmem:[#allocation16_spill] sm:$0xff] }
  0x55   :  { %516 = vmatpush.msrb.mxu3 %v1055_v47  ;;  %529 = vmatpush.msra.mxu0 %v953_v12  ;;  %v1455_v12 = vld [vmem:[#allocation15_spill] sm:$0xff] }
  0x56   :  { %552 = vmatpush.msra.mxu1 %v967_v17  ;;  %495 = vmatpush.msrb.mxu2 %v1080_v55  ;;  %v1458_v17 = vld [vmem:[#allocation17_spill] sm:$0xff]  ;;  %v62_v50 = vld [vmem:[#allocation8] ss:$8 sm:$0x3] }
  0x57   :  { %517 = vmatpush.msrb.mxu3 %v1067_v51  ;;  %286 = vmatmul.f32.gmra.mxu0 %v1168_v41  ;;  %v319_v59 = vperm.slane %v62_v50, 1 }
  0x58   :  { %309 = vmatmul.f32.gmra.mxu1 %v1168_v41  ;;  %496 = vmatpush.msrb.mxu2 %v1094_v60  ;;  %v1474_v41 = vld [vmem:[#allocation33_spill] sm:$0xff] }
  0x59   :  { %518 = vmatpush.msrb.mxu3 %v1082_v56  ;;  %530 = vmatpush.msra.mxu0 %v965_v16  ;;  %v1457_v16 = vld [vmem:[#allocation34_spill] sm:$0xff] }
  0x5a   :  { %607 = vmatpush.msra.mxu2 %v1103_v62  ;;  %553 = vmatpush.msra.mxu1 %v979_v21  ;;  %v1460_v21 = vld [vmem:[#allocation19_spill] sm:$0xff] }
  0x5b   :  { %519 = vmatpush.msrb.mxu3 %v1096_v61  ;;  %531 = vmatpush.msra.mxu0 %v977_v20  ;;  %v1459_v20 = vld [vmem:[#allocation18_spill] sm:$0xff] }
  0x5c   :  { %608 = vmatpush.msra.mxu2 %v1115_v54  ;;  %554 = vmatpush.msra.mxu1 %v991_v25  ;;  %v1462_v25 = vld [vmem:[#allocation21_spill] sm:$0xff] }
  0x5d   :  { %630 = vmatpush.msra.mxu3 %v1105_v63  ;;  %532 = vmatpush.msra.mxu0 %v989_v24  ;;  %v1461_v24 = vld [vmem:[#allocation20_spill] sm:$0xff] }
  0x5e   :  { %609 = vmatpush.msra.mxu2 %v1125_v58  ;;  %555 = vmatpush.msra.mxu1 %v1452_v8 }
  0x5f   :  { %631 = vmatpush.msra.mxu3 %v1117_v53  ;;  %497 = vmatmul.f32.vlgmr.msrb.gmra.mxu2 %v1143_v4 }
  0x60   :  { %610 = vmatpush.msra.mxu2 %v1131_v44  ;;  %533 = vmatpush.msra.mxu0 %v1001_v28  ;;  %v1464_v28 = vld [vmem:[#allocation22_spill] sm:$0xff] }
  0x61   :  { %632 = vmatpush.msra.mxu3 %v1127_v45  ;;  %556 = vmatpush.msra.mxu1 %v1455_v12 }
  0x62   :  { %611 = vmatpush.msra.mxu2 %v1148_v49  ;;  %520 = vmatmul.f32.vlgmr.msrb.gmra.mxu3 %v1143_v4 }
  0x63   :  { %633 = vmatpush.msra.mxu3 %v1453_v10  ;;  %534 = vmatpush.msra.mxu0 %v1454_v11 }
  0x64   :  { %612 = vmatpush.msra.mxu2 %v1156_v57  ;;  %557 = vmatpush.msra.mxu1 %v1458_v17  ;;  %v318_v57 = vperm.slane %v62_v50, 0 }
  0x65   :  { %634 = vmatpush.msra.mxu3 %v1150_v32  ;;  %535 = vmatpush.msra.mxu0 %v1456_v15  ;;  %v1468_v32 = vld [vmem:[#allocation26_spill] sm:$0xff] }
  0x66   :  { %613 = vmatpush.msra.mxu2 %v1162_v29  ;;  %558 = vmatpush.msra.mxu1 %v1460_v21  ;;  %v1465_v29 = vld [vmem:[#allocation23_spill] sm:$0xff] }
  0x67   :  { %635 = vmatpush.msra.mxu3 %v1457_v16  ;;  %536 = vmatpush.msra.mxu0 %v1459_v20 }
  0x68   :  { %614 = vmatpush.msra.mxu2 %v1177_v40  ;;  %559 = vmatpush.msra.mxu1 %v1462_v25 }
  0x69   :  { %636 = vmatpush.msra.mxu3 %v1166_v37  ;;  %500 = vmatmul.f32.gmra.mxu2 %v1170_v0  ;;  %v1472_v37 = vld [vmem:[#allocation30_spill] sm:$0xff] }
  0x6a   :  { %615 = vmatpush.msra.mxu2 %v1185_v1  ;;  %537 = vmatpush.msra.mxu0 %v1461_v24 }
  0x6b   :  { %637 = vmatpush.msra.mxu3 %v1179_v2  ;;  %560 = vmatpush.msra.mxu1 %v1465_v29 }
  0x6c   :  { %616 = vmatpush.msra.mxu2 %v1193_v3  ;;  %523 = vmatmul.f32.gmra.mxu3 %v1170_v0 }
  0x6d   :  { %638 = vmatpush.msra.mxu3 %v1463_v27  ;;  %538 = vmatpush.msra.mxu0 %v1464_v28 }
  0x6e   :  { %617 = vmatpush.msra.mxu2 %v1202_v52  ;;  %561 = vmatpush.msra.mxu1 %v1467_v31 }
  0x6f   :  { %639 = vmatpush.msra.mxu3 %v1197_v5  ;;  %539 = vmatpush.msra.mxu0 %v1466_v30 }
  0x70   :  { %618 = vmatpush.msra.mxu2 %v1209_v6  ;;  %562 = vmatpush.msra.mxu1 %v1469_v33 }
  0x71   :  { %640 = vmatpush.msra.mxu3 %v1204_v7  ;;  %540 = vmatpush.msra.mxu0 %v1468_v32 }
  0x72   :  { %619 = vmatpush.msra.mxu2 %v1219_v9  ;;  %563 = vmatpush.msra.mxu1 %v1471_v36 }
  0x73   :  { %641 = vmatpush.msra.mxu3 %v1211_v48  ;;  %541 = vmatpush.msra.mxu0 %v1470_v34 }
  0x74   :  { %620 = vmatpush.msra.mxu2 %v1227_v14  ;;  %564 = vmatpush.msra.mxu1 %v1473_v39 }
  0x75   :  { %642 = vmatpush.msra.mxu3 %v1221_v13  ;;  %542 = vmatpush.msra.mxu0 %v1472_v37 }
  0x76   :  { %621 = vmatpush.msra.mxu2 %v1235_v19  ;;  %543 = vmatmul.f32.vlgmr.msra.gmra.mxu0 %v413_v35 }
  0x77   :  { %643 = vmatpush.msra.mxu3 %v1229_v18  ;;  %565 = vmatpush.msra.mxu1 %v1474_v41 }
  0x78   :  { %622 = vmatpush.msra.mxu2 %v1243_v23  ;;  %566 = vmatmul.f32.vlgmr.msra.gmra.mxu1 %v413_v35 }
  0x79   :  { %644 = vmatpush.msra.mxu3 %v1237_v22  ;;  %623 = vmatmul.f32.vlgmr.msra.gmra.mxu2 %v573_v38 }
  0x7b   :  { %645 = vmatpush.msra.mxu3 %v1245_v26 }
  0x7c   :  { %646 = vmatmul.f32.vlgmr.msra.gmra.mxu3 %v573_v38 }
  0x7e   :  { %546 = vmatmul.f32.gmra.mxu0 %v414_v42 }
  0x80   :  { %569 = vmatmul.f32.gmra.mxu1 %v414_v42 }
  0x81   :  { %626 = vmatmul.f32.gmra.mxu2 %v574_v43 }
  0x84   :  { %649 = vmatmul.f32.gmra.mxu3 %v574_v43 }
  0xb6   :  { %v157_v44 = vpop.f32.mrf.mxu0  ;;  %v203_v48 = vpop.f32.mrf.mxu2 }
  0xb7   :  { %v226_v49 = vpop.f32.mrf.mxu3  ;;  %v204_v51 = vadd.f32 %v203_v48, %v157_v44 }
  0xb8   :  { %v180_v45 = vpop.f32.mrf.mxu1 }
  0xb9   :  { %v227_v53 = vadd.f32 %v226_v49, %v180_v45 }
  0xc0   :  { %v206_v60 = vpop.f32.mrf.mxu2 }
  0xc2   :  { %v160_v46 = vpop.f32.mrf.mxu0 }
  0xc3   :  { %v207_v4 = vadd.f32 %v206_v60, %v160_v46 }
  0xc4   :  { %v183_v47 = vpop.f32.mrf.mxu1  ;;  %v229_v61 = vpop.f32.mrf.mxu3 }
  0xc5   :  { %v230_v0 = vadd.f32 %v229_v61, %v183_v47 }
  0xcc   :  { %v284_v54 = vpop.f32.mrf.mxu0 }
  0xcd   :  { %v307_v55 = vpop.f32.mrf.mxu1  ;;  %v313_v56 = vadd.f32 %v284_v54, %v204_v51 }
  0xce   :  { %v314_v58 = vadd.f32 %v307_v55, %v227_v53 }
  0xcf   :  { %v322_v62 = vadd.f32 %v318_v57, %v313_v56 }
  0xd0   :  { %v323_v63 = vadd.f32 %v319_v59, %v314_v58 }
  0xd1   :  { %v1336_v1 = vmax.f32 %v322_v62, 0.0 }
  0xd2   :  { %v1338_v3 = vmax.f32 %v323_v63, 0.0 }
  0xd3   :  { %v342_v19 = vmul.f32 %v1336_v1, %v1336_v1 }
  0xd4   :  { %v287_v40 = vpop.f32.mrf.mxu0  ;;  %v330_v13 = vadd.f32 %v1338_v3, %v1336_v1  ;;  %v343_v22 = vmul.f32 %v1338_v3, %v1338_v3 }
  0xd5   :  { %v310_v2 = vpop.f32.mrf.mxu1  ;;  %v315_v5 = vadd.f32 %v287_v40, %v207_v4 }
  0xd6   :  { %v316_v52 = vadd.f32 %v310_v2, %v230_v0  ;;  %v346_v8 = vadd.f32 %v343_v22, %v342_v19 }
  0xd7   :  { %v324_v7 = vadd.f32 %v318_v57, %v315_v5 }
  0xd8   :  { %v325_v6 = vadd.f32 %v319_v59, %v316_v52 }
  0xd9   :  { %v1340_v9 = vmax.f32 %v324_v7, 0.0 }
  0xda   :  { %v1344_v14 = vmax.f32 %v325_v6, 0.0 }
  0xdb   :  { %v331_v18 = vadd.f32 %v330_v13, %v1340_v9  ;;  %v344_v26 = vmul.f32 %v1340_v9, %v1340_v9 }
  0xdc   :  { %v345_v11 = vmul.f32 %v1344_v14, %v1344_v14 }
  0xdd   :  { %v332_v23 = vadd.f32 %v331_v18, %v1344_v14  ;;  %v347_v10 = vadd.f32 %v346_v8, %v344_v26 }
  0xdf   :  { %333 = vadd.xlane.f32.xlu0 %v332_v23  ;;  %v348_v12 = vadd.f32 %v347_v10, %v345_v11 }
  0xe2   :  { %v498_v15 = vpop.f32.mrf.mxu2 }
  0xe5   :  { %v521_v16 = vpop.f32.mrf.mxu3 }
  0xe7   :  { %349 = vadd.xlane.f32.xlu0 %v348_v12 }
  0xec   :  { %v501_v17 = vpop.f32.mrf.mxu2 }
  0xef   :  { %v524_v20 = vpop.f32.mrf.mxu3 }
  0xf3   :  { %v544_v21 = vpop.f32.mrf.mxu0 }
  0xf4   :  { %v545_v25 = vadd.f32 %v544_v21, %v498_v15 }
  0xf5   :  { %v567_v24 = vpop.f32.mrf.mxu1 }
  0xf6   :  { %v568_v27 = vadd.f32 %v567_v24, %v521_v16 }
  0xfb   :  { %v547_v31 = vpop.f32.mrf.mxu0 }
  0xfc   :  { %v624_v28 = vpop.f32.mrf.mxu2  ;;  %v548_v36 = vadd.f32 %v547_v31, %v501_v17 }
  0xfd   :  { %v653_v29 = vadd.f32 %v624_v28, %v545_v25  ;;  %v570_v34 = vpop.f32.mrf.mxu1 }
  0xfe   :  { %v571_v39 = vadd.f32 %v570_v34, %v524_v20 }
  0xff   :  { %v647_v30 = vpop.f32.mrf.mxu3  ;;  %v657_v32 = vadd.f32 %v653_v29, %v318_v57 }
 0x100   :  { %v654_v33 = vadd.f32 %v647_v30, %v568_v27 }
 0x101   :  { %v1356_v37 = vmax.f32 %v657_v32, 0.0 }
 0x102   :  { %v658_v35 = vadd.f32 %v654_v33, %v319_v59 }
 0x103   :  { %v677_v44 = vmul.f32 %v1356_v37, %v1356_v37 }
 0x104   :  { %v1358_v38 = vmax.f32 %v658_v35, 0.0  ;;  %v627_v41 = vpop.f32.mrf.mxu2  ;;  %v64_v35 = vld [vmem:[#allocation8 + $0x1] ss:$8 sm:$0x3] }
 0x105   :  { %v655_v42 = vadd.f32 %v627_v41, %v548_v36  ;;  %v66_v36 = vld [vmem:[#allocation8 + $0x2] ss:$8 sm:$0x3] }
 0x106   :  { %v665_v47 = vadd.f32 %v1358_v38, %v1356_v37  ;;  %v678_v48 = vmul.f32 %v1358_v38, %v1358_v38 }
 0x107   :  { %v650_v43 = vpop.f32.mrf.mxu3  ;;  %v659_v45 = vadd.f32 %v655_v42, %v318_v57 }
 0x108   :  { %v656_v46 = vadd.f32 %v650_v43, %v571_v39  ;;  %v681_v55 = vadd.f32 %v678_v48, %v677_v44  ;;  %v387_v44 = vperm.slane %v64_v35, 0  ;;  %v397_v48 = vperm.slane %v66_v36, 1 }
 0x109   :  { %v1366_v49 = vmax.f32 %v659_v45, 0.0  ;;  %v388_v45 = vperm.slane %v64_v35, 1 }
 0x10a   :  { %v660_v50 = vadd.f32 %v656_v46, %v319_v59 }
 0x10b   :  { %v666_v53 = vadd.f32 %v665_v47, %v1366_v49  ;;  %v679_v54 = vmul.f32 %v1366_v49, %v1366_v49  ;;  %v396_v47 = vperm.slane %v66_v36, 0 }
 0x10c   :  { %v1368_v51 = vmax.f32 %v660_v50, 0.0 }
 0x10d   :  { %v682_v58 = vadd.f32 %v681_v55, %v679_v54 }
 0x10e   :  { %v667_v56 = vadd.f32 %v666_v53, %v1368_v51  ;;  %v680_v57 = vmul.f32 %v1368_v51, %v1368_v51 }
 0x110   :  { %668 = vadd.xlane.f32.xlu1 %v667_v56  ;;  %v683_v60 = vadd.f32 %v682_v58, %v680_v57 }
 0x118   :  { %684 = vadd.xlane.f32.xlu1 %v683_v60 }
 0x152   :  { %v334_v61 = vpop.xlane.xlu0 %333 }
 0x153   :  { %v335_v62 = vrot.slane %v334_v61, 4 }
 0x155   :  { %v336_v59 = vadd.f32 %v335_v62, %v334_v61 }
 0x157   :  { %v337_v63 = vrot.slane %v336_v59, 2 }
 0x159   :  { %v338_v4 = vadd.f32 %v337_v63, %v336_v59 }
 0x15a   :  { %v350_v0 = vpop.xlane.xlu0 %349 }
 0x15b   :  { %v351_v40 = vrot.slane %v350_v0, 4  ;;  %v339_v2 = vrot.slane %v338_v4, 1 }
 0x15d   :  { %v352_v5 = vadd.f32 %v351_v40, %v350_v0  ;;  %v340_v52 = vadd.f32 %v339_v2, %v338_v4 }
 0x15f   :  { %v353_v7 = vrot.slane %v352_v5, 2  ;;  %754 = vpush %v340_v52 }
 0x161   :  { %v354_v6 = vadd.f32 %v353_v7, %v352_v5 }
 0x163   :  { %v355_v13 = vrot.slane %v354_v6, 1 }
 0x165   :  { %v356_v18 = vadd.f32 %v355_v13, %v354_v6 }
 0x167   :  { %756 = vpush %v356_v18 }
 0x183   :  { %v669_v19 = vpop.xlane.xlu1 %668 }
 0x184   :  { %v670_v23 = vrot.slane %v669_v19, 4 }
 0x186   :  { %v671_v10 = vadd.f32 %v670_v23, %v669_v19 }
 0x188   :  { %v672_v12 = vrot.slane %v671_v10, 2 }
 0x18a   :  { %v673_v21 = vadd.f32 %v672_v12, %v671_v10 }
 0x18b   :  { %v685_v22 = vpop.xlane.xlu1 %684 }
 0x18c   :  { %v686_v26 = vrot.slane %v685_v22, 4  ;;  %v674_v28 = vrot.slane %v673_v21, 1 }
 0x18e   :  { %v687_v11 = vadd.f32 %v686_v26, %v685_v22  ;;  %v675_v32 = vadd.f32 %v674_v28, %v673_v21 }
 0x190   :  { %s755_s2 = spop %754  ;;  %v688_v16 = vrot.slane %v687_v11, 2 }
 0x191   :  { %s1376_s29 = smul.f32 0.00024414063, %s755_s2 }
 0x192   :  { %v689_v24 = vadd.f32 %v688_v16, %v687_v11 }
 0x193   :  { %s360_s30 = smul.f32 %s1376_s29, %s1376_s29  ;;  %v363_v34 = vstv %s1376_s29 }
 0x194   :  { %v690_v29 = vrot.slane %v689_v24, 1  ;;  %v364_v39 = vsub.f32 %v1336_v1, %v363_v34  ;;  %v365_v41 = vsub.f32 %v1338_v3, %v363_v34  ;;  %v366_v42 = vsub.f32 %v1340_v9, %v363_v34 }
 0x195   :  { %v367_v43 = vsub.f32 %v1344_v14, %v363_v34 }
 0x196   :  { %v691_v33 = vadd.f32 %v690_v29, %v689_v24 }
 0x198   :  { %s757_s4 = spop %756 }
 0x199   :  { %s359_s5 = smul.f32 0.00024414063, %s757_s4 }
 0x19b   :  { %s361_s6 = ssub.f32 %s359_s5, %s360_s30 }
 0x19d   :  { %s362_s8 = smax.f32 %s890_s7, %s361_s6 }
 0x19e   :  { %s368_s9 = sadd.f32 1e-05, %s362_s8 }
 0x1a0   :  { %v369_v8 = vstv %s368_s9 }
 0x1a1   :  { %776 = vrsqrt.f32 %v369_v8  ;;  %vm376_vm1 = vweird.f32 %v369_v8 }
 0x1a7   :  { %v777_v15 = vpop.eup %776 }
 0x1a8   :  { %v371_v17 = vmul.f32 %v777_v15, %v369_v8  ;;  %vm377_vm0 = vweird.f32 %v777_v15 }
 0x1a9   :  { %vm378_vm2 = vmor %vm376_vm1, %vm377_vm0 }
 0x1aa   :  { %v372_v20 = vmul.f32 %v777_v15, %v371_v17 }
 0x1ac   :  { %v373_v25 = vmul.f32 0.5, %v372_v20 }
 0x1ae   :  { %v374_v27 = vsub.f32 1.5, %v373_v25 }
 0x1b0   :  { %v375_v30 = vmul.f32 %v777_v15, %v374_v27 }
 0x1b2   :  { %v379_v31 = vsel %vm378_vm2, %v777_v15, %v375_v30 }
 0x1b3   :  { %758 = vpush %v379_v31 }
 0x1b4   :  { %760 = vpush %v675_v32 }
 0x1b5   :  { %762 = vpush %v691_v33 }
 0x1e4   :  { %s759_s10 = spop %758 }
 0x1e5   :  { %v381_v46 = vstv %s759_s10  ;;  %s761_s11 = spop %760 }
 0x1e6   :  { %v382_v50 = vmul.f32 %v381_v46, %v364_v39  ;;  %v383_v53 = vmul.f32 %v381_v46, %v365_v41  ;;  %v384_v54 = vmul.f32 %v381_v46, %v366_v42  ;;  %v385_v55 = vmul.f32 %v381_v46, %v367_v43  ;;  %s1386_s12 = smul.f32 0.00024414063, %s761_s11  ;;  %s763_s13 = spop %762 }
 0x1e7   :  { %s694_s14 = smul.f32 0.00024414063, %s763_s13 }
 0x1e8   :  { %v391_v1 = vmul.f32 %v387_v44, %v382_v50  ;;  %v392_v3 = vmul.f32 %v388_v45, %v383_v53  ;;  %v393_v9 = vmul.f32 %v387_v44, %v384_v54  ;;  %v394_v14 = vmul.f32 %v388_v45, %v385_v55  ;;  %s695_s15 = smul.f32 %s1386_s12, %s1386_s12 }
 0x1e9   :  { %v698_v5 = vstv %s1386_s12 }
 0x1ea   :  { %v400_v56 = vadd.f32 %v396_v47, %v391_v1  ;;  %v401_v57 = vadd.f32 %v397_v48, %v392_v3  ;;  %v402_v58 = vadd.f32 %v396_v47, %v393_v9  ;;  %s696_s16 = ssub.f32 %s694_s14, %s695_s15  ;;  %v403_v60 = vadd.f32 %v397_v48, %v394_v14 }
 0x1eb   :  { %v699_v52 = vsub.f32 %v1356_v37, %v698_v5  ;;  %v700_v7 = vsub.f32 %v1358_v38, %v698_v5  ;;  %v701_v6 = vsub.f32 %v1366_v49, %v698_v5  ;;  %v702_v13 = vsub.f32 %v1368_v51, %v698_v5 }
 0x1ec   :  { %404 = vst [vmem:[#allocation9] sm:$0xff] %v400_v56  ;;  %s697_s17 = smax.f32 %s890_s7, %s696_s16 }
 0x1ed   :  { %405 = vst [vmem:[#allocation9 + $0x8] sm:$0xff] %v401_v57  ;;  %s703_s18 = sadd.f32 1e-05, %s697_s17 }
 0x1ee   :  { %406 = vst [vmem:[#allocation9 + $0x10] sm:$0xff] %v402_v58 }
 0x1ef   :  { %407 = vst [vmem:[#allocation9 + $0x18] sm:$0xff] %v403_v60  ;;  %v704_v61 = vstv %s703_s18 }
 0x1f0   :  { %778 = vrsqrt.f32 %v704_v61  ;;  %vm711_vm4 = vweird.f32 %v704_v61 }
 0x1f6   :  { %v779_v62 = vpop.eup %778 }
 0x1f7   :  { %v706_v59 = vmul.f32 %v779_v62, %v704_v61  ;;  %vm712_vm3 = vweird.f32 %v779_v62 }
 0x1f8   :  { %vm713_vm5 = vmor %vm711_vm4, %vm712_vm3 }
 0x1f9   :  { %v707_v63 = vmul.f32 %v779_v62, %v706_v59 }
 0x1fb   :  { %v708_v4 = vmul.f32 0.5, %v707_v63 }
 0x1fd   :  { %v709_v0 = vsub.f32 1.5, %v708_v4 }
 0x1ff   :  { %v710_v40 = vmul.f32 %v779_v62, %v709_v0 }
 0x201   :  { %v714_v2 = vsel %vm713_vm5, %v779_v62, %v710_v40 }
 0x202   :  { %764 = vpush %v714_v2 }
 0x233   :  { %s765_s19 = spop %764 }
 0x234   :  { %v716_v18 = vstv %s765_s19 }
 0x235   :  { %v717_v19 = vmul.f32 %v716_v18, %v699_v52  ;;  %v718_v22 = vmul.f32 %v716_v18, %v700_v7  ;;  %v719_v23 = vmul.f32 %v716_v18, %v701_v6  ;;  %v720_v26 = vmul.f32 %v716_v18, %v702_v13 }
 0x237   :  { %v721_v8 = vmul.f32 %v717_v19, %v387_v44  ;;  %v722_v10 = vmul.f32 %v718_v22, %v388_v45  ;;  %v723_v11 = vmul.f32 %v719_v23, %v387_v44  ;;  %v724_v12 = vmul.f32 %v720_v26, %v388_v45 }
 0x239   :  { %v725_v15 = vadd.f32 %v721_v8, %v396_v47  ;;  %v726_v16 = vadd.f32 %v722_v10, %v397_v48  ;;  %v727_v17 = vadd.f32 %v723_v11, %v396_v47  ;;  %v728_v37 = vadd.f32 %v724_v12, %v397_v48 }
 0x23b   :  { %730 = vst [vmem:[#allocation9 + $0x20] sm:$0xff] %v725_v15 }
 0x23c   :  { %731 = vst [vmem:[#allocation9 + $0x28] sm:$0xff] %v726_v16 }
 0x23d   :  { %732 = vst [vmem:[#allocation9 + $0x30] sm:$0xff] %v727_v17 }
 0x23e   :  { %733 = vst [vmem:[#allocation9 + $0x38] sm:$0xff] %v728_v37 }
 0x23f   :  { %746 = dma.vmem_to_hbm [thread:$0]  %s739_s23, 1024, %s741_s25, [#allocation5], %s883_s20, %s883_s20, %s884_s21  }
 0x240   :  { %880 = dma.done.wait [#allocation5], 1024  }
 0x241   :  { %881 = vsyncadd [#allocation5], 4294966272 }
 0x242   :  { %751 = vsyncpa [#allocation4], 1 }
 0x243   :  { %752 = vsyncpa [#allocation7], 1 }
 0x244   :  { %753 = vsyncpa [#allocation5], 1 }

</bundles_post_ra>
